<compile_context>
chip_gen: v7x
topology: tpu7x:2x2x1
jax: 0.10.0
libtpu: 0.0.40
codegen_flags: <defaults>
</compile_context>

<pallas_src>
import functools
import math

import jax
import jax.numpy as jnp
from jax.experimental import pallas as pl
from jax.experimental.pallas import tpu as pltpu


def _round_up(x, m):
    return (x + m - 1) // m * m


def _supports_bf16_act():
    """bf16 VPU/EUP exists on v6e / v7x; keep f32 activations elsewhere (v5e etc.)."""
    try:
        kind = jax.devices()[0].device_kind.lower()
    except Exception:
        return False
    return any(tag in kind for tag in ("v6", "v7", "7x"))


def _lstm_fc_kernel(x_ref, wg_ref, bg_ref, wfc_ref, bfc_ref, out_ref, *, bf16_act):
    # x tile: (TB, D) bf16 (cast host-side); MXU matmul, f32 accumulate, f32 bias.
    # Column layout of gates (each slab HP = round_up(2H,128) lanes wide, lane-aligned):
    #   [ i_fwd | i_bwd | 0pad ][ g_fwd | g_bwd | 0pad ][ o_fwd | o_bwd | 0pad ]
    gates = (jnp.dot(x_ref[...], wg_ref[...], preferred_element_type=jnp.float32)
             + bg_ref[...])
    hp = gates.shape[-1] // 3                        # padded slab width (>= 2H)

    if bf16_act:
        gates = gates.astype(jnp.bfloat16)           # v6e/v7x: bf16 EUP/VPU ~2x f32

    i_s = jax.nn.sigmoid(gates[:, 0:hp])             # (TB, HP)
    g_s = jnp.tanh(gates[:, hp:2 * hp])              # (TB, HP)
    o_s = jax.nn.sigmoid(gates[:, 2 * hp:3 * hp])    # (TB, HP)

    # c = sigmoid(i)*tanh(g) (c_prev == 0);  h = sigmoid(o)*tanh(c)
    # First 2H lanes are [h_fwd | h_bwd] == torch concat order; padded lanes are
    # exactly 0 (sigmoid(0)*tanh(sigmoid(0)*tanh(0)) = 0) and hit zero FC rows.
    h = o_s * jnp.tanh(i_s * g_s)

    out = (jnp.dot(h.astype(jnp.bfloat16), wfc_ref[...],
                   preferred_element_type=jnp.float32)
           + bfc_ref[...])
    out_ref[...] = out.astype(out_ref.dtype)         # bf16 store -> half the writeback


def lstm_classifier_forward(x, params, *, training=False, block_b=1024,
                            min_grid_steps=2, bf16_act=None,
                            out_store_dtype=jnp.bfloat16):
    """x: (B, input_dim) float32/bfloat16. params: packed dict from init_params()."""
    if training:
        # TODO(synk): training-mode dropout(p=0.3) mask not implemented in-kernel.
        raise NotImplementedError("LSTMClassifier kernel only supports eval mode "
                                  "(dropout is identity).")
    if bf16_act is None:
        bf16_act = _supports_bf16_act()

    B, D = x.shape
    O = params["output_dim"]
    w_gates = params["w_gates"]          # (D, 3*HP)  bf16
    b_gates = params["b_gates"]          # (1, 3*HP)  f32
    w_fc = params["w_fc_pad"]            # (HP, OP)   bf16, OP = 128-padded output
    b_fc = params["b_fc_pad"]            # (1, OP)    f32
    G = w_gates.shape[1]
    HP = w_fc.shape[0]
    OP = w_fc.shape[1]

    # Host-side bf16 x: identical rounding point to an in-kernel cast, half the DMA.
    x = x.astype(jnp.bfloat16)

    # Batch tiling: TB multiple of 16 (bf16 sublane pairs). No host-side pad of x:
    # grid = cdiv(B, TB); Pallas masks the partial tail block (rows independent).
    tile = 16
    TB = min(block_b, _round_up(B, tile))
    if min_grid_steps > 1 and B > tile:
        # Keep >=2 grid steps so the "parallel" batch axis splits over both v7x TCs.
        TB = min(TB, _round_up(pl.cdiv(B, min_grid_steps), tile))
    grid = (pl.cdiv(B, TB),)

    kernel = functools.partial(_lstm_fc_kernel, bf16_act=bf16_act)

    out = pl.pallas_call(
        kernel,
        out_shape=jax.ShapeDtypeStruct((B, OP), out_store_dtype),
        grid=grid,
        in_specs=[
            pl.BlockSpec((TB, D), lambda i: (i, 0)),    # streamed x tiles
            pl.BlockSpec((D, G), lambda i: (0, 0)),     # resident packed gate weights
            pl.BlockSpec((1, G), lambda i: (0, 0)),     # resident packed gate bias
            pl.BlockSpec((HP, OP), lambda i: (0, 0)),   # resident FC weight
            pl.BlockSpec((1, OP), lambda i: (0, 0)),    # resident FC bias
        ],
        out_specs=pl.BlockSpec((TB, OP), lambda i: (i, 0)),
        compiler_params=pltpu.CompilerParams(
            dimension_semantics=("parallel",)),          # v7x: split batch over 2 TCs
    )(x, w_gates, b_gates, w_fc, b_fc)

    return out[:, :O].astype(jnp.float32)


def init_params(key, input_dim, hidden_dim, output_dim, *, out_pad_lanes=128):
    """PyTorch-style init (uniform(-1/sqrt(fan), 1/sqrt(fan))), then host-side repack:
       fuse directions, drop dead forget gate, pad each gate slab to 128 lanes,
       bf16 weights, lane-pad the FC output."""
    ks = jax.random.split(key, 8)
    bl = 1.0 / math.sqrt(hidden_dim)
    bf = 1.0 / math.sqrt(2 * hidden_dim)
    u = lambda k, shape, b: jax.random.uniform(k, shape, jnp.float32, -b, b)
    H = hidden_dim
    HP = _round_up(2 * H, 128)           # lane-aligned slab width per gate

    # PyTorch layout: W_ih (4H, D) rows ordered [i, f, g, o]; b_ih, b_hh (4H,)
    raw = dict(
        w_ih_f=u(ks[0], (4 * H, input_dim), bl), b_ih_f=u(ks[1], (4 * H,), bl),
        b_hh_f=u(ks[2], (4 * H,), bl),
        w_ih_b=u(ks[3], (4 * H, input_dim), bl), b_ih_b=u(ks[4], (4 * H,), bl),
        b_hh_b=u(ks[5], (4 * H,), bl),
        w_fc=u(ks[6], (output_dim, 2 * H), bf), b_fc=u(ks[7], (output_dim,), bf),
    )

    def gate_w(g):                       # (D, HP) = [fwd | bwd | zero-pad]
        wf = raw["w_ih_f"][g * H:(g + 1) * H, :].T
        wb = raw["w_ih_b"][g * H:(g + 1) * H, :].T
        pad = jnp.zeros((input_dim, HP - 2 * H), jnp.float32)
        return jnp.concatenate([wf, wb, pad], axis=1)

    def gate_b(g):                       # (HP,) summed bias, zero-padded
        bfw = (raw["b_ih_f"] + raw["b_hh_f"])[g * H:(g + 1) * H]
        bbw = (raw["b_ih_b"] + raw["b_hh_b"])[g * H:(g + 1) * H]
        return jnp.concatenate([bfw, bbw, jnp.zeros((HP - 2 * H,), jnp.float32)])

    # Gate order: input (0), cell (2), output (3); forget (1) dropped (c_prev == 0).
    w_gates = jnp.concatenate([gate_w(0), gate_w(2), gate_w(3)], axis=1)   # (D, 3*HP)
    b_gates = jnp.concatenate([gate_b(0), gate_b(2), gate_b(3)]).reshape(1, -1)

    # FC weight (HP, OP), rows >= 2H and columns >= O are zero; pad sliced off outside.
    OP = _round_up(max(output_dim, 1), out_pad_lanes)
    w_fc_pad = jnp.zeros((HP, OP), jnp.float32).at[:2 * H, :output_dim].set(raw["w_fc"].T)
    b_fc_pad = jnp.zeros((1, OP), jnp.float32).at[:, :output_dim].set(raw["b_fc"])

    params = {
        "w_gates": w_gates.astype(jnp.bfloat16),    # (D, 3*HP)
        "b_gates": b_gates,                         # (1, 3*HP) f32
        "w_fc_pad": w_fc_pad.astype(jnp.bfloat16),  # (HP, OP)
        "b_fc_pad": b_fc_pad,                       # (1, OP) f32
        "output_dim": output_dim,
    }
    return params, raw


def reference_packed(x, params, *, bf16_act=False):
    """Plain-JAX mirror of the exact kernel math (same casts / packing)."""
    O = params["output_dim"]
    xb = x.astype(jnp.bfloat16)
    gates = (jnp.dot(xb, params["w_gates"], preferred_element_type=jnp.float32)
             + params["b_gates"])
    hp = gates.shape[-1] // 3
    if bf16_act:
        gates = gates.astype(jnp.bfloat16)
    i_s = jax.nn.sigmoid(gates[:, :hp])
    g_s = jnp.tanh(gates[:, hp:2 * hp])
    o_s = jax.nn.sigmoid(gates[:, 2 * hp:])
    h = o_s * jnp.tanh(i_s * g_s)
    out = (jnp.dot(h.astype(jnp.bfloat16), params["w_fc_pad"],
                   preferred_element_type=jnp.float32) + params["b_fc_pad"])
    out = out.astype(jnp.bfloat16).astype(jnp.float32)   # mirrors bf16 store
    return out[:, :O]


def reference_pytorch_f32(x, raw):
    """Full-precision f32 reference of the original PyTorch forward (eval mode)."""
    def cell(w_ih, b_ih, b_hh):
        g = x @ w_ih.T + b_ih + b_hh
        H = g.shape[-1] // 4
        i = jax.nn.sigmoid(g[:, :H])
        f = jax.nn.sigmoid(g[:, H:2 * H])      # dead: c_prev == 0
        gg = jnp.tanh(g[:, 2 * H:3 * H])
        o = jax.nn.sigmoid(g[:, 3 * H:])
        c = i * gg + f * 0.0
        return o * jnp.tanh(c)
    h = jnp.concatenate([cell(raw["w_ih_f"], raw["b_ih_f"], raw["b_hh_f"]),
                         cell(raw["w_ih_b"], raw["b_ih_b"], raw["b_hh_b"])], axis=-1)
    return h @ raw["w_fc"].T + raw["b_fc"]


if __name__ == "__main__":
    batch, input_dim, hidden_dim, output_dim = 32, 16, 32, 4

    key = jax.random.PRNGKey(0)
    k_x, k_p = jax.random.split(key)
    x = jax.random.normal(k_x, (batch, input_dim), dtype=jnp.float32)
    params, raw = init_params(k_p, input_dim, hidden_dim, output_dim)

    # Run 1: f32 activations (valid on every generation); block_b=16 -> 2 grid
    # steps, exercising the streamed-batch pipeline and the >=2-step constraint.
    out = lstm_classifier_forward(x, params, block_b=16, bf16_act=False)
    out = jax.block_until_ready(out)
    assert out.shape == (batch, output_dim)
    ref_exact = reference_packed(x, params, bf16_act=False)
    assert jnp.allclose(out, ref_exact, atol=5e-3, rtol=5e-3), \
        "mismatch vs packed reference"
    ref_f32 = reference_pytorch_f32(x, raw)
    assert jnp.allclose(out, ref_f32, atol=1e-2, rtol=1e-2), \
        "mismatch vs f32 PyTorch reference"

    # Run 2: production defaults (block_b=1024; bf16 activations auto-enabled on
    # v6e/v7x only). Slightly looser tolerance covers bf16 sigmoid/tanh rounding.
    out2 = lstm_classifier_forward(x, params)
    out2 = jax.block_until_ready(out2)
    assert out2.shape == (batch, output_dim)
    assert jnp.allclose(out2, ref_f32, atol=2e-2, rtol=2e-2), \
        "mismatch vs f32 PyTorch reference (default mode)"

    print("KERNEL_OK")
</pallas_src>

<mosaic_0001>
module attributes {stable_mosaic.version = 11 : i64} {
  func.func @_lstm_fc_kernel(%arg0: i32, %arg1: memref<16x16xbf16, #tpu.memory_space<vmem>>, %arg2: memref<16x384xbf16, #tpu.memory_space<vmem>>, %arg3: memref<1x384xf32, #tpu.memory_space<vmem>>, %arg4: memref<128x128xbf16, #tpu.memory_space<vmem>>, %arg5: memref<1x128xf32, #tpu.memory_space<vmem>>, %arg6: memref<16x128xbf16, #tpu.memory_space<vmem>>) attributes {dimension_semantics = [#tpu.dimension_semantics<parallel>], iteration_bounds = array<i64: 2>, scalar_prefetch = 0 : i64, scratch_operands = 0 : i64, tpu.core_type = #tpu.core_type<tc>, window_params = [{transform_indices = @transform_0, window_bounds = array<i64: 16, 16>}, {pipeline_mode = #tpu.pipeline_mode<synchronous>, transform_indices = @transform_1, window_bounds = array<i64: 16, 384>}, {pipeline_mode = #tpu.pipeline_mode<synchronous>, transform_indices = @transform_2, window_bounds = array<i64: 1, 384>}, {pipeline_mode = #tpu.pipeline_mode<synchronous>, transform_indices = @transform_3, window_bounds = array<i64: 128, 128>}, {pipeline_mode = #tpu.pipeline_mode<synchronous>, transform_indices = @transform_4, window_bounds = array<i64: 1, 128>}, {transform_indices = @transform_5, window_bounds = array<i64: 16, 128>}]} {
    %c0 = arith.constant 0 : index
    %c0_0 = arith.constant 0 : index
    %0 = vector.load %arg1[%c0, %c0_0] : memref<16x16xbf16, #tpu.memory_space<vmem>>, vector<16x16xbf16>
    %c0_1 = arith.constant 0 : index
    %c0_2 = arith.constant 0 : index
    %1 = vector.load %arg2[%c0_1, %c0_2] : memref<16x384xbf16, #tpu.memory_space<vmem>>, vector<16x384xbf16>
    %cst = arith.constant dense<0.000000e+00> : vector<16x384xf32>
    %2 = tpu.matmul %0, %1, %cst {dimension_numbers = #tpu.dot_dimension_numbers<[1], [0], [0], [1], [0, 0, 1, 1], [], []>} : vector<16x16xbf16>, vector<16x384xbf16>, vector<16x384xf32> -> vector<16x384xf32>
    %c0_3 = arith.constant 0 : index
    %c0_4 = arith.constant 0 : index
    %3 = vector.load %arg3[%c0_3, %c0_4] : memref<1x384xf32, #tpu.memory_space<vmem>>, vector<1x384xf32>
    %4 = vector.broadcast %3 : vector<1x384xf32> to vector<16x384xf32>
    %5 = arith.addf %2, %4 : vector<16x384xf32>
    %6 = vector.extract_strided_slice %5 {offsets = [0, 0], sizes = [16, 128], strides = [1, 1]} : vector<16x384xf32> to vector<16x128xf32>
    %7 = arith.negf %6 : vector<16x128xf32>
    %8 = math.exp %7 : vector<16x128xf32>
    %cst_5 = arith.constant 1.000000e+00 : f32
    %9 = vector.broadcast %cst_5 : f32 to vector<16x128xf32>
    %10 = arith.addf %9, %8 : vector<16x128xf32>
    %11 = arith.divf %9, %10 : vector<16x128xf32>
    %12 = vector.extract_strided_slice %5 {offsets = [0, 128], sizes = [16, 128], strides = [1, 1]} : vector<16x384xf32> to vector<16x128xf32>
    %13 = math.tanh %12 : vector<16x128xf32>
    %14 = vector.extract_strided_slice %5 {offsets = [0, 256], sizes = [16, 128], strides = [1, 1]} : vector<16x384xf32> to vector<16x128xf32>
    %15 = arith.negf %14 : vector<16x128xf32>
    %16 = math.exp %15 : vector<16x128xf32>
    %cst_6 = arith.constant 1.000000e+00 : f32
    %17 = vector.broadcast %cst_6 : f32 to vector<16x128xf32>
    %18 = arith.addf %17, %16 : vector<16x128xf32>
    %19 = arith.divf %17, %18 : vector<16x128xf32>
    %20 = arith.mulf %11, %13 : vector<16x128xf32>
    %21 = math.tanh %20 : vector<16x128xf32>
    %22 = arith.mulf %19, %21 : vector<16x128xf32>
    %23 = arith.truncf %22 : vector<16x128xf32> to vector<16x128xbf16>
    %c0_7 = arith.constant 0 : index
    %c0_8 = arith.constant 0 : index
    %24 = vector.load %arg4[%c0_7, %c0_8] : memref<128x128xbf16, #tpu.memory_space<vmem>>, vector<128x128xbf16>
    %cst_9 = arith.constant dense<0.000000e+00> : vector<16x128xf32>
    %25 = tpu.matmul %23, %24, %cst_9 {dimension_numbers = #tpu.dot_dimension_numbers<[1], [0], [0], [1], [0, 0, 1, 1], [], []>} : vector<16x128xbf16>, vector<128x128xbf16>, vector<16x128xf32> -> vector<16x128xf32>
    %c0_10 = arith.constant 0 : index
    %c0_11 = arith.constant 0 : index
    %26 = vector.load %arg5[%c0_10, %c0_11] : memref<1x128xf32, #tpu.memory_space<vmem>>, vector<1x128xf32>
    %27 = vector.broadcast %26 : vector<1x128xf32> to vector<16x128xf32>
    %28 = arith.addf %25, %27 : vector<16x128xf32>
    %29 = arith.truncf %28 : vector<16x128xf32> to vector<16x128xbf16>
    %c0_12 = arith.constant 0 : index
    %c0_13 = arith.constant 0 : index
    %30 = vector.load %arg6[%c0_12, %c0_13] : memref<16x128xbf16, #tpu.memory_space<vmem>>, vector<16x128xbf16>
    tpu.vector_store %arg6[%c0_12, %c0_13], %29 {strides = array<i32>} : memref<16x128xbf16, #tpu.memory_space<vmem>>, vector<16x128xbf16>,
    return
  }
  func.func @transform_0(%arg0: i32) -> (i32, i32) {
    %c0_i32 = arith.constant 0 : i32
    %c0_i32_0 = arith.constant 0 : i32
    return %arg0, %c0_i32 : i32, i32
  }
  func.func @transform_1(%arg0: i32) -> (i32, i32) {
    %c0_i32 = arith.constant 0 : i32
    %c0_i32_0 = arith.constant 0 : i32
    %c0_i32_1 = arith.constant 0 : i32
    return %c0_i32, %c0_i32_0 : i32, i32
  }
  func.func @transform_2(%arg0: i32) -> (i32, i32) {
    %c0_i32 = arith.constant 0 : i32
    %c0_i32_0 = arith.constant 0 : i32
    %c0_i32_1 = arith.constant 0 : i32
    return %c0_i32, %c0_i32_0 : i32, i32
  }
  func.func @transform_3(%arg0: i32) -> (i32, i32) {
    %c0_i32 = arith.constant 0 : i32
    %c0_i32_0 = arith.constant 0 : i32
    %c0_i32_1 = arith.constant 0 : i32
    return %c0_i32, %c0_i32_0 : i32, i32
  }
  func.func @transform_4(%arg0: i32) -> (i32, i32) {
    %c0_i32 = arith.constant 0 : i32
    %c0_i32_0 = arith.constant 0 : i32
    %c0_i32_1 = arith.constant 0 : i32
    return %c0_i32, %c0_i32_0 : i32, i32
  }
  func.func @transform_5(%arg0: i32) -> (i32, i32) {
    %c0_i32 = arith.constant 0 : i32
    %c0_i32_0 = arith.constant 0 : i32
    return %arg0, %c0_i32 : i32, i32
  }
}

</mosaic_0001>

<bundles_post_ra>
// kernel: tpu_custom_call.1
= control target key start
LH: loop header
LB: loop body
LE: loop exit
PB: predicated region body
PF: predicated region fallthrough
CT: control target
= control target key end

     0   :  { %10 = vsyncpa [#allocation3], 0  ;;  %s1078_s0 = inlined_call_operand.vmem [shape: bf16[32,16], index: 0, kind: input, shape index: {}]   ;;  %s1079_s1 = inlined_call_operand.vmem [shape: bf16[16,384], index: 1, kind: input, shape index: {}]   ;;  %s1080_s2 = inlined_call_operand.vmem [shape: f32[1,384], index: 2, kind: input, shape index: {}]   ;;  %s1081_s3 = inlined_call_operand.hbm [shape: bf16[128,128], index: 3, kind: input, shape index: {}]   ;;  %s1082_s4 = inlined_call_operand.vmem [shape: f32[1,128], index: 4, kind: input, shape index: {}]   ;;  %s1083_s5 = inlined_call_operand.hbm [shape: bf16[32,128], index: 5, kind: output, shape index: {}]  }
   0x1   :  { %11 = vsyncpa [#allocation4], 0 }
   0x2   :  { %13 = vsyncpa [#allocation4 + $0x1], 0  ;;  %s926_s18 = smov 0   ;;  %s928_s19 = smov 0  }
   0x3   :  { %s930_s20 = smov 0   ;;  %s932_s21 = smov 0  }
   0x4 LB: > { %s947_s22 = sadd.s32 4294967295, %s885_s21   ;;  %s617_s23 = sadd.s32 4294967294, %s885_s21   ;;  %s885_s21 = sphi %s932_s21, %s1099_s21   ;;  %s881_s20 = sphi %s930_s20, %s1098_s20   ;;  %s877_s19 = sphi %s928_s19, %s1097_s19   ;;  %s873_s18 = sphi %s926_s18, %s1096_s18  }
   0x5   : > { %s951_s24 = sadd.s32 1, %s885_s21   ;;  %s136_s25 = sadd.s32 1, %s881_s20 }
   0x6   : > { %s133_s26 = ssub.s32 %s885_s21, %s951_s24  ;;  %p146_p0 = scmp.ne.s32.totalorder %s881_s20, %s877_s19 }
   0x7   : > { %p134_p1 = scmp.eq.s32.totalorder %s133_s26, 0  ;;  %p147_p2 = scmp.eq.s32.totalorder %s947_s22, 1 }
   0x8   : > { %p152_p3 = scmp.ne.s32.totalorder %s877_s19, %s873_s18  ;;  %p153_p4 = scmp.eq.s32.totalorder %s617_s23, 1 }
   0x9   : > { %s962_s27 = scalar_select %p134_p1, %s881_s20, %s136_s25  }
   0xa   : > { %p964_p5 = por %p147_p2, %p146_p0  ;;  %p968_p6 = por %p153_p4, %p152_p3 }
   0xb   : > { %p618_p7 = scmp.ge.s32.totalorder %s885_s21, 1  ;;  %p160_p8 = scmp.lt.s32.totalorder %s885_s21, 3 }
   0xc   : > { %s1087_s28 = scalar_select %p964_p5, 1, 0 }
   0xd   : > { %s1088_s29 = scalar_select %p968_p6, 1, 0 }
   0xe   : > { %p1084_p9 = scmp.eq.s32.totalorder %s947_s22, 0  ;;  %p975_p10 = pnand %p618_p7, %p160_p8 }
   0xf   : > { %s887_s6 = smov [#allocation2]   ;;  %s791_s11 = scalar_lea.hbm %s1081_s3, 1024 }
  0x10   : > { %s1089_s30 = scalar_select %p975_p10, 1, 0 }
  0x11   : > { %s178_s7 = sshll.u32 %s887_s6, 4  ;;  %p703_p11 = pneg %p975_p10  ;;  %s179_s7 = int_to_ptr.vmem [resolvable:$true] %s178_s7 }
  0x12   : > { %p792_p13 = scmp.ne.s32.totalorder %s1081_s3, %s791_s11  ;;  %p798_p3 = scmp.lt.u32.totalorder %s791_s11, %s1081_s3 }
  0x13   : > { %p983_p12 = pnand %p1084_p9, %p703_p11 }
  0x15   : > { %p793_p0 = pneg %p983_p12 }
  0x17   : > { %p794_p1 = pnand %p793_p0, %p792_p13 }
  0x19   : > { %p795_p2 = pneg %p794_p1 }
  0x1b   : > { %p800_p4 = pnand %p798_p3, %p795_p2 }
  0x1d   : > { %803 = shalt.err (!%p800_p4)
}
  0x1e   : > { %s804_s16 = scalar_lea.vmem %s179_s7, 1024  ;;  %p812_p9 = scmp.lt.s32.totalorder %s179_s7, %s179_s7 }
  0x1f   : > { %p805_p7 = scmp.ne.s32.totalorder %s179_s7, %s804_s16  ;;  %p813_p6 = scmp.lt.s32.totalorder %s804_s16, %s804_s16 }
  0x21   : > { %p807_p8 = pnand %p805_p7, %p793_p0  ;;  %p814_p5 = por %p813_p6, %p812_p9 }
  0x23   : > { %p808_p11 = pneg %p807_p8 }
  0x25   : > { %p815_p10 = pnand %p814_p5, %p808_p11 }
  0x27   : > { %818 = shalt.err (!%p815_p10)
}
  0x28   : > { %s888_s17 = smov 64   ;;  %s889_s23 = smov 4  }
  0x29   : > { %706 = dma.hbm_to_vmem [thread:$0]  (!%p983_p12), %s1081_s3, 1024, %s179_s7, [#allocation3], %s888_s17, %s888_s17, %s889_s23  }
  0x2a   : > { %p1091_p13 = scmp.ne.s32.totalorder %s1089_s30, 0 }
  0x2b   : > { %p1092_p1 = scmp.eq.s32.totalorder (!%p1091_p13), %s947_s22, 0 }
  0x2c   : > { %206 = sbr.rel (%p1091_p13) target bundleno = 551 (0x227), region = 40 }
  0x33   : > { %864 = dma.done.wait (%p1092_p1), [#allocation3], 1024   ;;  %p1093_p0 = pmov %p1092_p1 }
  0x34   : > { %s624_s6 = sshll.u32 %s947_s22, 1  ;;  %v890_v0 = vmov 0   ;;  %v891_v1 = vmov 0.0   ;;  %vm892_vm0 = vmmov 0   ;;  %v754_v2 = vld [vmem:[%s1079_s1 + $0x4] ss:$12 sps:$4 sm:$0xff]   ;;  %v250_v14 = vlaneseq }
  0x35   : > { %866 = vsyncadd (%p1093_p0), [#allocation3], 4294966272  ;;  %322 = vmatprep.mubr.bf16.mxu1 %v890_v0  ;;  %p235_p5 = scmp.lt.s32.totalorder %s624_s6, 3  ;;  %677 = vmatprep.subr.bf16.mxu0 %v891_v1  ;;  %v756_v3 = vld [vmem:[%s1079_s1] ss:$12 sps:$4 sm:$0xff]   ;;  %vm286_vm1 = vcmask 130048  }
  0x36   : > { %693 = vmatprep.mubr.msk.bf16.mxu0 %vm892_vm0, %v891_v1  ;;  %290 = vmatprep.subr.bf16.mxu1 %v754_v2  ;;  %v758_v5 = vld [vmem:[%s1079_s1 + $0x8] ss:$12 sps:$4 sm:$0xff]   ;;  %v759_v6 = vld [vmem:[#allocation2] sm:$0xff]   ;;  %v760_v7 = vld [vmem:[#allocation2 + $0x8] sm:$0xff]   ;;  %v251_v15 = vshrl.u32 %v250_v14, 7  ;;  %s231_s23 = sand.u32 1, %s877_s19  }
  0x37   : > { %s1101_s6 = smov (!%p235_p5, %s624_s6), 3  ;;  %291 = vmatpush1.bf16.msra.mxu1 %v756_v3  ;;  %678 = vmatpush3.bf16.msra.mxu0 %v759_v6  ;;  %v761_v8 = vld [vmem:[#allocation2 + $0x10] sm:$0xff]   ;;  %v762_v9 = vld [vmem:[#allocation2 + $0x18] sm:$0xff]   ;;  %v763_v10 = vld [vmem:[#allocation2 + $0x20] sm:$0xff]   ;;  %s623_s25 = sshll.u32 %s231_s23, 3 }
  0x38   : > { %s625_s7 = sshll.u32 %s1101_s6, 2  ;;  %671 = vmatprep.subr.bf16.mxu1 %v891_v1  ;;  %679 = vmatprep.subr.bf16.mxu0 %v891_v1  ;;  %v764_v11 = vld [vmem:[#allocation2 + $0x28] sm:$0xff]   ;;  %v765_v12 = vld [vmem:[#allocation2 + $0x30] sm:$0xff]   ;;  %v766_v13 = vld [vmem:[#allocation2 + $0x38] sm:$0xff]   ;;  %v252_v16 = vsub.s32 0, %v251_v15  ;;  %v260_v22 = vsub.s32 2, %v251_v15 }
  0x39   : > { %s238_s9 = scalar_lea.vmem %s1078_s0, %s625_s7  ;;  %v248_v17 = vld [vmem:[%s1080_s2] sm:$0x7]  ;;  %v256_v27 = vsub.s32 1, %v251_v15  ;;  %s233_s7 = scalar_lea.vmem [#allocation5], %s623_s25 }
  0x3a   : > { %v757_v4 = vld [vmem:[%s238_s9] sm:$0xff]   ;;  %v253_v18 = vrot.slane %v248_v17, %v252_v16  ;;  %v261_v29 = vrot.slane %v248_v17, %v260_v22  ;;  %s543_s8 = sshll.u32 %s233_s7, 4  ;;  %s654_s30 = sshll.u32 %s947_s22, 7  ;;  %s1030_s8 = int_to_ptr.vmem [resolvable:$true] %s543_s8 }
  0x3b   : > { %630 = vmatmul.mubr.msk.bf16.vlgmr.msra.gmra.mrb[0].mxu1 %vm286_vm1, %v757_v4  ;;  %680 = vmatpush3.bf16.msra.mxu0 %v760_v7  ;;  %v257_v31 = vrot.slane %v248_v17, %v256_v27  ;;  %v636_v62 = vld [vmem:[%s1082_s4] ss:$0 sm:$0xff]  ;;  %s1035_s11 = scalar_lea.hbm %s1083_s5, %s654_s30  ;;  %s1037_s12 = scalar_lea.sflag [#allocation4], %s231_s23 }
  0x3c   : > { %672 = vmatpush3.bf16.msra.mxu1 %v758_v5  ;;  %673 = vmatprep.mubr.msk.bf16.mxu1 %vm892_vm0, %v891_v1  ;;  %s819_s13 = scalar_lea.vmem %s1030_s8, 128  ;;  %p1094_p9 = scmp.ne.s32.totalorder %s1087_s28, 0 }
  0x3d   : > { %681 = vmatprep.subr.bf16.mxu0 %v891_v1  ;;  %p820_p6 = scmp.ne.s32.totalorder %s1030_s8, %s819_s13  ;;  %s893_s22 = smov [#allocation5]  }
  0x3e   : > { %s823_s14 = sshll.u32 %s893_s22, 4  ;;  %s824_s14 = int_to_ptr.vmem [resolvable:$false] %s823_s14 }
  0x3f   : > { %682 = vmatpush3.bf16.msra.mxu0 %v761_v8  ;;  %p821_p10 = pnand %p820_p6, %p1094_p9  ;;  %s825_s15 = scalar_lea.vmem %s824_s14, 256 }
  0x40   : > { %683 = vmatprep.subr.bf16.mxu0 %v891_v1  ;;  %p826_p2 = scmp.lt.s32.totalorder %s1030_s8, %s824_s14  ;;  %p827_p3 = scmp.lt.s32.totalorder %s825_s15, %s819_s13 }
  0x41   : > { %p822_p12 = pneg %p821_p10 }
  0x42   : > { %p828_p4 = por %p827_p3, %p826_p2 }
  0x43   : > { %674 = vmatmul.mubr.msk.bf16.vlgmr.msra.gmra.mrb[4].mxu1 %vm286_vm1, %v757_v4  ;;  %684 = vmatpush3.bf16.msra.mxu0 %v762_v9 }
  0x44   : > { %685 = vmatprep.subr.bf16.mxu0 %v891_v1  ;;  %p829_p7 = pnand %p828_p4, %p822_p12 }
  0x47   : > { %686 = vmatpush3.bf16.msra.mxu0 %v763_v10 }
  0x48   : > { %687 = vmatprep.subr.bf16.mxu0 %v891_v1 }
  0x4b   : > { %688 = vmatpush3.bf16.msra.mxu0 %v764_v11 }
  0x4c   : > { %689 = vmatprep.subr.bf16.mxu0 %v891_v1 }
  0x4f   : > { %690 = vmatpush3.bf16.msra.mxu0 %v765_v12 }
  0x50   : > { %691 = vmatprep.subr.bf16.mxu0 %v891_v1 }
  0x53   : > { %692 = vmatpush3.bf16.msra.mxu0 %v766_v13 }
 0x10e   : > { %v324_v19 = vpop.f32.mrb[0].mxu1 }
 0x10f   : > { %v325_v20 = vadd.f32 %v324_v19, %v253_v18  ;;  %v326_v21 = vpop.f32.mrb[1].mxu1 }
 0x110   : > { %v328_v23 = vpop.f32.mrb[2].mxu1  ;;  %v327_v38 = vadd.f32 %v326_v21, %v257_v31 }
 0x111   : > { %v632_v24 = vmul.f32 -1.442695, %v325_v20  ;;  %v329_v25 = vadd.f32 %v328_v23, %v253_v18  ;;  %v330_v26 = vpop.f32.mrb[3].mxu1 }
 0x112   : > { %v331_v41 = vadd.f32 %v330_v26, %v257_v31 }
 0x113   : > { %767 = vpow2.f32 %v632_v24  ;;  %v633_v28 = vmul.f32 -1.442695, %v329_v25 }
 0x115   : > { %769 = vpow2.f32 %v633_v28 }
 0x116   : > { %v367_v30 = vpop.f32.mrb[4].mxu1 }
 0x117   : > { %v368_v32 = vadd.f32 %v367_v30, %v261_v29  ;;  %v675_v33 = vpop.f32.mrb[5].mxu1 }
 0x118   : > { %v370_v34 = vpop.f32.mrb[6].mxu1 }
 0x119   : > { %v634_v35 = vmul.f32 -1.442695, %v368_v32  ;;  %v371_v36 = vadd.f32 %v370_v34, %v261_v29  ;;  %v676_v37 = vpop.f32.mrb[7].mxu1 }
 0x11b   : > { %771 = vpow2.f32 %v634_v35  ;;  %v635_v39 = vmul.f32 -1.442695, %v371_v36 }
 0x11d   : > { %v768_v40 = vpop.eup %767  ;;  %773 = vpow2.f32 %v635_v39 }
 0x11e   : > { %v380_v42 = vadd.f32 1.0, %v768_v40  ;;  %775 = vtanh.f32 %v327_v38 }
 0x11f   : > { %v770_v43 = vpop.eup %769 }
 0x120   : > { %777 = vrcp.f32 %v380_v42  ;;  %v381_v44 = vadd.f32 1.0, %v770_v43 }
 0x121   : > { %779 = vtanh.f32 %v331_v41 }
 0x122   : > { %781 = vrcp.f32 %v381_v44 }
 0x125   : > { %v772_v45 = vpop.eup %771 }
 0x126   : > { %v394_v47 = vadd.f32 1.0, %v772_v45 }
 0x127   : > { %v774_v46 = vpop.eup %773 }
 0x128   : > { %v776_v48 = vpop.eup %775  ;;  %v395_v50 = vadd.f32 1.0, %v774_v46  ;;  %783 = vrcp.f32 %v394_v47 }
 0x12a   : > { %v778_v49 = vpop.eup %777 }
 0x12b   : > { %v780_v51 = vpop.eup %779  ;;  %v400_v52 = vmul.f32 %v778_v49, %v776_v48 }
 0x12c   : > { %v782_v53 = vpop.eup %781 }
 0x12d   : > { %785 = vtanh.f32 %v400_v52  ;;  %v401_v54 = vmul.f32 %v782_v53, %v780_v51 }
 0x12e   : > { %787 = vrcp.f32 %v395_v50 }
 0x12f   : > { %789 = vtanh.f32 %v401_v54 }
 0x132   : > { %v784_v55 = vpop.eup %783 }
 0x137   : > { %v786_v56 = vpop.eup %785 }
 0x138   : > { %v788_v57 = vpop.eup %787  ;;  %v404_v58 = vmul.f32 %v786_v56, %v784_v55 }
 0x139   : > { %v790_v59 = vpop.eup %789 }
 0x13a   : > { %v405_v60 = vmul.f32 %v790_v59, %v788_v57 }
 0x13c   : > { %v406_v61 = vpack.c.bf16 %v405_v60, %v404_v58 }
 0x13e   : > { %694 = vmatmul.mubr.bf16.vlgmr.msra.gmra.mrb[0].mxu0 %v406_v61 }
 0x211   : > { %v512_v63 = vpop.f32.mrb[0].mxu0 }
 0x212   : > { %v695_v0 = vpop.f32.mrb[1].mxu0  ;;  %v513_v2 = vadd.f32 %v636_v62, %v512_v63 }
 0x213   : > { %v515_v1 = vpop.f32.mrb[2].mxu0 }
 0x214   : > { %v516_v3 = vadd.f32 %v636_v62, %v515_v1  ;;  %v696_v4 = vpop.f32.mrb[3].mxu0 }
 0x216   : > { %v658_v5 = vpack.c.bf16 %v516_v3, %v513_v2 }
 0x218   : > { %659 = vst [vmem:[%s233_s7] sm:$0xff] %v658_v5  }
 0x219   : > { %832 = shalt.err (!%p829_p7)
}
 0x21a   : > { %s833_s16 = scalar_lea.hbm %s1035_s11, 128  ;;  %s837_s25 = scalar_lea.hbm %s1083_s5, 256 }
 0x21b   : > { %p834_p8 = scmp.ne.s32.totalorder %s1035_s11, %s833_s16  ;;  %p838_p1 = scmp.lt.u32.totalorder %s1035_s11, %s1083_s5 }
 0x21c   : > { %p839_p0 = scmp.lt.u32.totalorder %s837_s25, %s833_s16  ;;  %p841_p6 = scmp.lt.u32.totalorder %s833_s16, %s1035_s11 }
 0x21d   : > { %p835_p11 = pnand %p834_p8, %p1094_p9 }
 0x21e   : > { %p840_p5 = por %p839_p0, %p838_p1 }
 0x21f   : > { %p836_p13 = pneg %p835_p11 }
 0x220   : > { %p842_p10 = por %p841_p6, %p840_p5 }
 0x222   : > { %p843_p12 = pnand %p842_p10, %p836_p13 }
 0x224   : > { %846 = shalt.err (!%p843_p12)
}
 0x225   : > { %s894_s7 = smov 64   ;;  %s895_s30 = smov 4  }
 0x226   : > { %701 = dma.vmem_to_hbm [thread:$0]  (%p1094_p9), %s1030_s8, 128, %s1035_s11, %s1037_s12, %s894_s7, %s894_s7, %s895_s30  }
 0x227 PF: > { %p713_p2 = scmp.ge.s32.totalorder %s885_s21, 2  ;;  %s558_s9 = sand.u32 1, %s873_s18  }
 0x228   : > { %p1095_p3 = scmp.ne.s32.totalorder %s1088_s29, 0  ;;  %s559_s10 = scalar_lea.sflag [#allocation4], %s558_s9 }
 0x22a   : > { %p708_p4 = pnand %p713_p2, %p1095_p3 }
 0x22c   : > { %868 = dma.done.wait (!%p708_p4), %s559_s10, 128  }
 0x22d   : > { %870 = vsyncadd (!%p708_p4), %s559_s10, 4294967168  ;;  %p16_p7 = scmp.ge.s32.totalorder %s951_s24, 4   ;;  %s1096_s18 = smov %s877_s19 }
 0x22e   : > { %s1097_s19 = smov %s881_s20  ;;  %s1098_s20 = smov %s962_s27 }
 0x22f   : > { %s1099_s21 = smov %s951_s24  ;;  %18 = sbr.rel (!%p16_p7) target bundleno = 4 (0x4), region = 80 }
 0x236   :  { %564 = vsyncpa [#allocation3], 1 }
 0x237   :  { %566 = vsyncpa [#allocation3 + $0x1], 1 }
 0x238   :  { %567 = vsyncpa [#allocation4], 1 }
 0x239   :  { %569 = vsyncpa [#allocation4 + $0x1], 1 }

</bundles_post_ra>
